<compile_context>
chip_gen: v6e
topology: v6e:2x2x1
jax: 0.10.0
libtpu: 0.0.40
codegen_flags: <defaults>
</compile_context>

<pallas_src>
import math

import jax
import jax.numpy as jnp
from jax.experimental import pallas as pl
from jax.experimental.pallas import tpu as pltpu

_LANE = 128


def _outconv_vpu_kernel(w_ref, b_ref, x_ref, o_ref):
    """Tiny-channel path.

    w_ref : (C_out, C_in) SMEM (f32 scalars)
    b_ref : (C_out,)      SMEM (f32 scalars)
    x_ref : (C_in, T)     VMEM (T = lane-dense spatial tile)
    o_ref : (C_out, T)    VMEM (lane-dense output)
    """
    c_out, c_in = w_ref.shape
    x = x_ref[...].astype(jnp.float32)                     # (C_in, T)
    for co in range(c_out):                                # unrolled (tiny)
        acc = w_ref[co, 0] * x[0:1, :]                     # (1, T) f32 FMA chain
        for ci in range(1, c_in):
            acc = acc + w_ref[co, ci] * x[ci:ci + 1, :]
        o_ref[co:co + 1, :] = (acc + b_ref[co]).astype(o_ref.dtype)


def _outconv_mxu_kernel(w_ref, b_ref, x_ref, o_ref):
    """Wide-channel path: one lane-dense MXU matmul per spatial tile.

    w_ref : (C_out, C_in) VMEM
    b_ref : (C_out, 1)    VMEM (f32)
    x_ref : (C_in, T)     VMEM
    o_ref : (C_out, T)    VMEM
    """
    acc = jnp.dot(w_ref[...], x_ref[...], preferred_element_type=jnp.float32)
    o_ref[...] = (acc + b_ref[...].astype(jnp.float32)).astype(o_ref.dtype)


def _pick_spatial_tile(hw, c_in, c_out, itemsize):
    """Largest sensible lane-axis tile: 128-divisible, VMEM-safe, tail-friendly."""
    budget = 2 * 1024 * 1024                  # per x block (x2 for double-buffering)
    t = budget // max(1, max(c_in, c_out) * itemsize)
    t = max(_LANE, min(t, 8192))
    t = (t // _LANE) * _LANE
    if hw <= t:
        return hw                             # full-axis block is always legal
    return t                                  # multiple of 128; ragged tail is masked


def outconv_pallas(x_nchw, weight, bias):
    """1x1 Conv2d (OutConv.forward), NCHW in / NCHW out.

    x_nchw : (N, C_in, H, W)
    weight : (C_out, C_in, 1, 1)   (PyTorch Conv2d weight layout)
    bias   : (C_out,)
    returns: (N, C_out, H, W)
    """
    N, C_in, H, W = x_nchw.shape
    C_out = weight.shape[0]
    HW = H * W

    x_rows = x_nchw.reshape(N, C_in, HW)      # free reshape, NO transpose
    tile_hw = _pick_spatial_tile(HW, C_in, C_out, x_nchw.dtype.itemsize)
    grid = (N, pl.cdiv(HW, tile_hw))

    x_spec = pl.BlockSpec((None, C_in, tile_hw), lambda n, t: (n, 0, t))
    o_spec = pl.BlockSpec((None, C_out, tile_hw), lambda n, t: (n, 0, t))

    use_vpu = (C_in <= 8 and C_out <= 8)
    if use_vpu:
        kernel = _outconv_vpu_kernel
        w_arg = weight.reshape(C_out, C_in).astype(jnp.float32)
        b_arg = bias.reshape(C_out).astype(jnp.float32)
        w_spec = pl.BlockSpec(memory_space=pltpu.MemorySpace.SMEM)
        b_spec = pl.BlockSpec(memory_space=pltpu.MemorySpace.SMEM)
    else:
        kernel = _outconv_mxu_kernel
        w_arg = weight.reshape(C_out, C_in).astype(x_nchw.dtype)
        b_arg = bias.reshape(C_out, 1).astype(jnp.float32)
        w_spec = pl.BlockSpec((C_out, C_in), lambda n, t: (0, 0))
        b_spec = pl.BlockSpec((C_out, 1), lambda n, t: (0, 0))

    out_rows = pl.pallas_call(
        kernel,
        out_shape=jax.ShapeDtypeStruct((N, C_out, HW), x_nchw.dtype),
        grid=grid,
        in_specs=[w_spec, b_spec, x_spec],
        out_specs=o_spec,
        compiler_params=pltpu.CompilerParams(
            dimension_semantics=("parallel", "parallel"),
        ),
    )(w_arg, b_arg, x_rows)

    # (N, C_out, H*W) -> NCHW is again a free reshape.
    return out_rows.reshape(N, C_out, H, W)


def init_outconv_params(key, in_channels, out_channels, dtype=jnp.float32):
    """Deterministic init matching nn.Conv2d defaults (kaiming-uniform bounds)."""
    k_w, k_b = jax.random.split(key)
    fan_in = in_channels * 1 * 1
    bound = 1.0 / math.sqrt(fan_in)
    weight = jax.random.uniform(
        k_w, (out_channels, in_channels, 1, 1), dtype, minval=-bound, maxval=bound
    )
    bias = jax.random.uniform(
        k_b, (out_channels,), dtype, minval=-bound, maxval=bound
    )
    return weight, bias


if __name__ == "__main__":
    key = jax.random.PRNGKey(0)
    k_x, k_p, k_x2, k_p2 = jax.random.split(key, 4)

    # OutConv-typical shape (tiny channels -> VPU/SMEM path).
    N, C_in, H, W = 2, 4, 16, 16
    C_out = 3
    x = jax.random.normal(k_x, (N, C_in, H, W), dtype=jnp.float32)
    weight, bias = init_outconv_params(k_p, C_in, C_out)

    y = outconv_pallas(x, weight, bias)
    jax.block_until_ready(y)

    y_ref = (
        jnp.einsum("nchw,oc->nohw", x, weight.reshape(C_out, C_in))
        + bias.reshape(1, C_out, 1, 1)
    )
    assert y.shape == (N, C_out, H, W)
    assert jnp.allclose(y, y_ref, atol=1e-5, rtol=1e-5)

    # Wider-channel case exercising the MXU path of the same wrapper.
    C_in2, C_out2 = 32, 16
    x2 = jax.random.normal(k_x2, (N, C_in2, H, W), dtype=jnp.float32)
    w2, b2 = init_outconv_params(k_p2, C_in2, C_out2)

    y2 = outconv_pallas(x2, w2, b2)
    jax.block_until_ready(y2)

    y2_ref = (
        jnp.einsum("nchw,oc->nohw", x2, w2.reshape(C_out2, C_in2))
        + b2.reshape(1, C_out2, 1, 1)
    )
    assert y2.shape == (N, C_out2, H, W)
    assert jnp.allclose(y2, y2_ref, atol=1e-4, rtol=1e-4)

    print("KERNEL_OK")
</pallas_src>

<mosaic_0001>
module attributes {stable_mosaic.version = 11 : i64} {
  func.func @_outconv_vpu_kernel(%arg0: i32, %arg1: i32, %arg2: memref<3x4xf32, #tpu.memory_space<smem>>, %arg3: memref<3xf32, #tpu.memory_space<smem>>, %arg4: memref<1x4x256xf32, #tpu.memory_space<vmem>>, %arg5: memref<1x3x256xf32, #tpu.memory_space<vmem>>) attributes {dimension_semantics = [#tpu.dimension_semantics<parallel>, #tpu.dimension_semantics<parallel>], iteration_bounds = array<i64: 2, 1>, scalar_prefetch = 0 : i64, scratch_operands = 0 : i64, tpu.core_type = #tpu.core_type<tc>, window_params = [{transform_indices = @transform_0, window_bounds = array<i64: 3, 4>}, {transform_indices = @transform_1, window_bounds = array<i64: 3>}, {transform_indices = @transform_2, window_bounds = array<i64: 1, 4, 256>}, {transform_indices = @transform_3, window_bounds = array<i64: 1, 3, 256>}]} {
    %c0 = arith.constant 0 : index
    %c0_0 = arith.constant 0 : index
    %c0_1 = arith.constant 0 : index
    %0 = vector.load %arg4[%c0, %c0_0, %c0_1] : memref<1x4x256xf32, #tpu.memory_space<vmem>>, vector<1x4x256xf32>
    %1 = vector.shape_cast %0 : vector<1x4x256xf32> to vector<4x256xf32>
    %c0_2 = arith.constant 0 : index
    %c0_3 = arith.constant 0 : index
    %2 = memref.load %arg2[%c0_2, %c0_3] : memref<3x4xf32, #tpu.memory_space<smem>>
    %3 = vector.extract_strided_slice %1 {offsets = [0, 0], sizes = [1, 256], strides = [1, 1]} : vector<4x256xf32> to vector<1x256xf32>
    %4 = vector.broadcast %2 : f32 to vector<1x256xf32>
    %5 = arith.mulf %4, %3 : vector<1x256xf32>
    %c0_4 = arith.constant 0 : index
    %c1 = arith.constant 1 : index
    %6 = memref.load %arg2[%c0_4, %c1] : memref<3x4xf32, #tpu.memory_space<smem>>
    %7 = vector.extract_strided_slice %1 {offsets = [1, 0], sizes = [1, 256], strides = [1, 1]} : vector<4x256xf32> to vector<1x256xf32>
    %8 = vector.broadcast %6 : f32 to vector<1x256xf32>
    %9 = arith.mulf %8, %7 : vector<1x256xf32>
    %10 = arith.addf %5, %9 : vector<1x256xf32>
    %c0_5 = arith.constant 0 : index
    %c2 = arith.constant 2 : index
    %11 = memref.load %arg2[%c0_5, %c2] : memref<3x4xf32, #tpu.memory_space<smem>>
    %12 = vector.extract_strided_slice %1 {offsets = [2, 0], sizes = [1, 256], strides = [1, 1]} : vector<4x256xf32> to vector<1x256xf32>
    %13 = vector.broadcast %11 : f32 to vector<1x256xf32>
    %14 = arith.mulf %13, %12 : vector<1x256xf32>
    %15 = arith.addf %10, %14 : vector<1x256xf32>
    %c0_6 = arith.constant 0 : index
    %c3 = arith.constant 3 : index
    %16 = memref.load %arg2[%c0_6, %c3] : memref<3x4xf32, #tpu.memory_space<smem>>
    %17 = vector.extract_strided_slice %1 {offsets = [3, 0], sizes = [1, 256], strides = [1, 1]} : vector<4x256xf32> to vector<1x256xf32>
    %18 = vector.broadcast %16 : f32 to vector<1x256xf32>
    %19 = arith.mulf %18, %17 : vector<1x256xf32>
    %20 = arith.addf %15, %19 : vector<1x256xf32>
    %c0_7 = arith.constant 0 : index
    %21 = memref.load %arg3[%c0_7] : memref<3xf32, #tpu.memory_space<smem>>
    %22 = vector.broadcast %21 : f32 to vector<1x256xf32>
    %23 = arith.addf %20, %22 : vector<1x256xf32>
    %c0_8 = arith.constant 0 : index
    %c0_9 = arith.constant 0 : index
    %c0_10 = arith.constant 0 : index
    %24 = vector.load %arg5[%c0_8, %c0_9, %c0_10] : memref<1x3x256xf32, #tpu.memory_space<vmem>>, vector<1x1x256xf32>
    %25 = vector.shape_cast %24 : vector<1x1x256xf32> to vector<1x256xf32>
    %26 = vector.shape_cast %23 : vector<1x256xf32> to vector<1x1x256xf32>
    tpu.vector_store %arg5[%c0_8, %c0_9, %c0_10], %26 {strides = array<i32>} : memref<1x3x256xf32, #tpu.memory_space<vmem>>, vector<1x1x256xf32>,
    %c1_11 = arith.constant 1 : index
    %c0_12 = arith.constant 0 : index
    %27 = memref.load %arg2[%c1_11, %c0_12] : memref<3x4xf32, #tpu.memory_space<smem>>
    %28 = vector.extract_strided_slice %1 {offsets = [0, 0], sizes = [1, 256], strides = [1, 1]} : vector<4x256xf32> to vector<1x256xf32>
    %29 = vector.broadcast %27 : f32 to vector<1x256xf32>
    %30 = arith.mulf %29, %28 : vector<1x256xf32>
    %c1_13 = arith.constant 1 : index
    %c1_14 = arith.constant 1 : index
    %31 = memref.load %arg2[%c1_13, %c1_14] : memref<3x4xf32, #tpu.memory_space<smem>>
    %32 = vector.extract_strided_slice %1 {offsets = [1, 0], sizes = [1, 256], strides = [1, 1]} : vector<4x256xf32> to vector<1x256xf32>
    %33 = vector.broadcast %31 : f32 to vector<1x256xf32>
    %34 = arith.mulf %33, %32 : vector<1x256xf32>
    %35 = arith.addf %30, %34 : vector<1x256xf32>
    %c1_15 = arith.constant 1 : index
    %c2_16 = arith.constant 2 : index
    %36 = memref.load %arg2[%c1_15, %c2_16] : memref<3x4xf32, #tpu.memory_space<smem>>
    %37 = vector.extract_strided_slice %1 {offsets = [2, 0], sizes = [1, 256], strides = [1, 1]} : vector<4x256xf32> to vector<1x256xf32>
    %38 = vector.broadcast %36 : f32 to vector<1x256xf32>
    %39 = arith.mulf %38, %37 : vector<1x256xf32>
    %40 = arith.addf %35, %39 : vector<1x256xf32>
    %c1_17 = arith.constant 1 : index
    %c3_18 = arith.constant 3 : index
    %41 = memref.load %arg2[%c1_17, %c3_18] : memref<3x4xf32, #tpu.memory_space<smem>>
    %42 = vector.extract_strided_slice %1 {offsets = [3, 0], sizes = [1, 256], strides = [1, 1]} : vector<4x256xf32> to vector<1x256xf32>
    %43 = vector.broadcast %41 : f32 to vector<1x256xf32>
    %44 = arith.mulf %43, %42 : vector<1x256xf32>
    %45 = arith.addf %40, %44 : vector<1x256xf32>
    %c1_19 = arith.constant 1 : index
    %46 = memref.load %arg3[%c1_19] : memref<3xf32, #tpu.memory_space<smem>>
    %47 = vector.broadcast %46 : f32 to vector<1x256xf32>
    %48 = arith.addf %45, %47 : vector<1x256xf32>
    %c0_20 = arith.constant 0 : index
    %c1_21 = arith.constant 1 : index
    %c0_22 = arith.constant 0 : index
    %49 = vector.load %arg5[%c0_20, %c1_21, %c0_22] : memref<1x3x256xf32, #tpu.memory_space<vmem>>, vector<1x1x256xf32>
    %50 = vector.shape_cast %49 : vector<1x1x256xf32> to vector<1x256xf32>
    %51 = vector.shape_cast %48 : vector<1x256xf32> to vector<1x1x256xf32>
    tpu.vector_store %arg5[%c0_20, %c1_21, %c0_22], %51 {strides = array<i32>} : memref<1x3x256xf32, #tpu.memory_space<vmem>>, vector<1x1x256xf32>,
    %c2_23 = arith.constant 2 : index
    %c0_24 = arith.constant 0 : index
    %52 = memref.load %arg2[%c2_23, %c0_24] : memref<3x4xf32, #tpu.memory_space<smem>>
    %53 = vector.extract_strided_slice %1 {offsets = [0, 0], sizes = [1, 256], strides = [1, 1]} : vector<4x256xf32> to vector<1x256xf32>
    %54 = vector.broadcast %52 : f32 to vector<1x256xf32>
    %55 = arith.mulf %54, %53 : vector<1x256xf32>
    %c2_25 = arith.constant 2 : index
    %c1_26 = arith.constant 1 : index
    %56 = memref.load %arg2[%c2_25, %c1_26] : memref<3x4xf32, #tpu.memory_space<smem>>
    %57 = vector.extract_strided_slice %1 {offsets = [1, 0], sizes = [1, 256], strides = [1, 1]} : vector<4x256xf32> to vector<1x256xf32>
    %58 = vector.broadcast %56 : f32 to vector<1x256xf32>
    %59 = arith.mulf %58, %57 : vector<1x256xf32>
    %60 = arith.addf %55, %59 : vector<1x256xf32>
    %c2_27 = arith.constant 2 : index
    %c2_28 = arith.constant 2 : index
    %61 = memref.load %arg2[%c2_27, %c2_28] : memref<3x4xf32, #tpu.memory_space<smem>>
    %62 = vector.extract_strided_slice %1 {offsets = [2, 0], sizes = [1, 256], strides = [1, 1]} : vector<4x256xf32> to vector<1x256xf32>
    %63 = vector.broadcast %61 : f32 to vector<1x256xf32>
    %64 = arith.mulf %63, %62 : vector<1x256xf32>
    %65 = arith.addf %60, %64 : vector<1x256xf32>
    %c2_29 = arith.constant 2 : index
    %c3_30 = arith.constant 3 : index
    %66 = memref.load %arg2[%c2_29, %c3_30] : memref<3x4xf32, #tpu.memory_space<smem>>
    %67 = vector.extract_strided_slice %1 {offsets = [3, 0], sizes = [1, 256], strides = [1, 1]} : vector<4x256xf32> to vector<1x256xf32>
    %68 = vector.broadcast %66 : f32 to vector<1x256xf32>
    %69 = arith.mulf %68, %67 : vector<1x256xf32>
    %70 = arith.addf %65, %69 : vector<1x256xf32>
    %c2_31 = arith.constant 2 : index
    %71 = memref.load %arg3[%c2_31] : memref<3xf32, #tpu.memory_space<smem>>
    %72 = vector.broadcast %71 : f32 to vector<1x256xf32>
    %73 = arith.addf %70, %72 : vector<1x256xf32>
    %c0_32 = arith.constant 0 : index
    %c2_33 = arith.constant 2 : index
    %c0_34 = arith.constant 0 : index
    %74 = vector.load %arg5[%c0_32, %c2_33, %c0_34] : memref<1x3x256xf32, #tpu.memory_space<vmem>>, vector<1x1x256xf32>
    %75 = vector.shape_cast %74 : vector<1x1x256xf32> to vector<1x256xf32>
    %76 = vector.shape_cast %73 : vector<1x256xf32> to vector<1x1x256xf32>
    tpu.vector_store %arg5[%c0_32, %c2_33, %c0_34], %76 {strides = array<i32>} : memref<1x3x256xf32, #tpu.memory_space<vmem>>, vector<1x1x256xf32>,
    return
  }
  func.func @transform_0(%arg0: i32, %arg1: i32) -> (i32, i32) {
    %c0_i32 = arith.constant 0 : i32
    %c0_i32_0 = arith.constant 0 : i32
    %c0_i32_1 = arith.constant 0 : i32
    return %c0_i32, %c0_i32_0 : i32, i32
  }
  func.func @transform_1(%arg0: i32, %arg1: i32) -> i32 {
    %c0_i32 = arith.constant 0 : i32
    %c0_i32_0 = arith.constant 0 : i32
    return %c0_i32 : i32
  }
  func.func @transform_2(%arg0: i32, %arg1: i32) -> (i32, i32, i32) {
    %c0_i32 = arith.constant 0 : i32
    %c0_i32_0 = arith.constant 0 : i32
    return %arg0, %c0_i32, %arg1 : i32, i32, i32
  }
  func.func @transform_3(%arg0: i32, %arg1: i32) -> (i32, i32, i32) {
    %c0_i32 = arith.constant 0 : i32
    %c0_i32_0 = arith.constant 0 : i32
    return %arg0, %c0_i32, %arg1 : i32, i32, i32
  }
}

</mosaic_0001>

<bundles_post_ra>
// kernel: tpu_custom_call.1
= control target key start
LH: loop header
LB: loop body
LE: loop exit
PB: predicated region body
PF: predicated region fallthrough
CT: control target
= control target key end

     0   :  { %8 = vsyncpa [#allocation4], 0  ;;  %s936_s0 = inlined_call_operand.hbm [shape: f32[3,4], index: 0, kind: input, shape index: {}]   ;;  %s937_s1 = inlined_call_operand.vmem [shape: f32[3], index: 1, kind: input, shape index: {}]   ;;  %s938_s2 = inlined_call_operand.hbm [shape: f32[2,4,256], index: 2, kind: input, shape index: {}]   ;;  %s939_s3 = inlined_call_operand.vmem [shape: f32[2,3,256], index: 3, kind: output, shape index: {}]  }
   0x1   :  { %9 = vsyncpa [#allocation5], 0 }
   0x2   :  { %10 = vsyncpa [#allocation3], 0 }
   0x3   :  { %12 = vsyncpa [#allocation3 + $0x1], 0  ;;  %s767_s12 = smov 0   ;;  %s769_s13 = smov 0  }
   0x4   :  { %s771_s14 = smov 0   ;;  %s773_s15 = smov 0  }
   0x5   :  { %s775_s16 = smov 0   ;;  %s777_s17 = smov 0  }
   0x6 LB: > { %s509_s18 = sadd.s32 4294967295, %s741_s17   ;;  %p94_p0 = scmp.ne.s32.totalorder %s725_s13, %s721_s12  ;;  %s741_s17 = sphi %s777_s17, %s18_s17   ;;  %s737_s16 = sphi %s775_s16, %s952_s16   ;;  %s733_s15 = sphi %s773_s15, %s951_s15   ;;  %s729_s14 = sphi %s771_s14, %s950_s14   ;;  %s725_s13 = sphi %s769_s13, %s949_s13   ;;  %s721_s12 = sphi %s767_s12, %s948_s12  }
   0x7   : > { %p797_p1 = scmp.eq.s32.totalorder %s509_s18, 0  ;;  %p511_p2 = scmp.ge.s32.totalorder %s741_s17, 1 }
   0x8   : > { %p133_p3 = scmp.lt.s32.totalorder %s741_s17, 3  ;;  %s155_s24 = sshll.u32 %s937_s1, 4  ;;  %s156_s24 = int_to_ptr.vmem [resolvable:$true] %s155_s24 }
   0x9   : > { %p805_p4 = por %p797_p1, %p94_p0  ;;  %s30_s26 = sadd.s32 1, %s737_s16 }
   0xa   : > { %p809_p5 = pnand %p511_p2, %p133_p3  ;;  %p825_p8 = scmp.ge.s32.totalorder %s30_s26, 2 }
   0xb   : > { %s743_s28 = smov [#allocation2]   ;;  %s640_s4 = scalar_lea.vmem %s156_s24, 16 }
   0xc   : > { %p562_p6 = pneg %p809_p5  ;;  %p641_p9 = scmp.ne.s32.totalorder %s156_s24, %s640_s4 }
   0xd   : > { %p648_p13 = scmp.lt.s32.totalorder %s156_s24, %s156_s24  ;;  %p649_p0 = scmp.lt.s32.totalorder %s640_s4, %s640_s4 }
   0xe   : > { %p820_p7 = pnand %p562_p6, %p797_p1 }
   0xf   : > { %p650_p2 = por %p649_p0, %p648_p13 }
  0x10   : > { %565 = dma.hbm_to_smem (!%p820_p7), %s936_s0, 64, %s743_s28, [#allocation4]  }
  0x11   : > { %p642_p10 = pneg %p820_p7 }
  0x13   : > { %p643_p11 = pnand %p642_p10, %p641_p9 }
  0x15   : > { %p644_p12 = pneg %p643_p11 }
  0x17   : > { %p651_p3 = pnand %p650_p2, %p644_p12 }
  0x19   : > { %654 = shalt.err (!%p651_p3)
}
  0x1a   : > { %s744_s5 = smov [#allocation6]   ;;  %s954_s26 = smov (%p825_p8, %s30_s26), 0 }
  0x1b   : > { %568 = dma.vmem_to_smem (!%p820_p7), %s156_s24, 16, %s744_s5, [#allocation5]  }
  0x1c   : > { %s81_s6 = sadd.s32 1, %s729_s14  ;;  %p88_p6 = scmp.ne.s32.totalorder %s729_s14, %s725_s13 }
  0x1d   : > { %s76_s7 = ssub.s32 %s737_s16, %s954_s26  ;;  %p89_p9 = scmp.eq.s32.totalorder %s741_s17, 0 }
  0x1e   : > { %p79_p10 = scmp.eq.s32.totalorder %s76_s7, 0  ;;  %p575_p11 = scmp.lt.s32.totalorder %s741_s17, 2 }
  0x1f   : > { %p90_p12 = por %p89_p9, %p88_p6  ;;  %s166_s8 = sand.u32 1, %s729_s14  }
  0x20   : > { %s851_s9 = scalar_select %p79_p10, %s729_s14, %s81_s6  }
  0x21   : > { %s515_s10 = sshll.u32 %s166_s8, 3  ;;  %s550_s11 = sshll.u32 %s737_s16, 7 }
  0x22   : > { %s178_s22 = scalar_lea.hbm %s938_s2, %s550_s11  ;;  %s170_s23 = scalar_lea.vmem [#allocation7], %s515_s10 }
  0x23   : > { %s180_s24 = sshll.u32 %s170_s23, 4  ;;  %p857_p7 = pnand %p575_p11, %p90_p12  ;;  %s181_s24 = int_to_ptr.vmem [resolvable:$true] %s180_s24 }
  0x24   : > { %s167_s27 = scalar_lea.sflag [#allocation3], %s166_s8  ;;  %s668_s28 = scalar_lea.vmem %s181_s24, 128 }
  0x25   : > { %p657_p8 = pneg %p857_p7  ;;  %p669_p13 = scmp.ne.s32.totalorder %s181_s24, %s668_s28 }
  0x26   : > { %s745_s29 = smov [#allocation7]  }
  0x27   : > { %p671_p0 = pnand %p669_p13, %p657_p8  ;;  %s673_s30 = sshll.u32 %s745_s29, 4  ;;  %s674_s30 = int_to_ptr.vmem [resolvable:$false] %s673_s30 }
  0x28   : > { %s675_s4 = scalar_lea.vmem %s674_s30, 256  ;;  %p676_p3 = scmp.lt.s32.totalorder %s181_s24, %s674_s30 }
  0x29   : > { %p672_p2 = pneg %p671_p0  ;;  %p677_p6 = scmp.lt.s32.totalorder %s675_s4, %s668_s28 }
  0x2b   : > { %p678_p9 = por %p677_p6, %p676_p3 }
  0x2d   : > { %p679_p10 = pnand %p678_p9, %p672_p2 }
  0x2f   : > { %682 = shalt.err (!%p679_p10)
}
  0x30   : > { %572 = dma.hbm_to_vmem [thread:$0]  (!%p857_p7), %s178_s22, 128, %s181_s24, %s167_s27  }
  0x31   : > { %189 = sbr.rel (%p809_p5) target bundleno = 98 (0x62), region = 32 }
  0x36   : > { %708 = dma.done.wait (%p797_p1), [#allocation4], 64  }
  0x37   : > { %710 = vsyncadd (%p797_p1), [#allocation4], 4294967232 }
  0x38   : > { %712 = dma.done.wait (%p797_p1), [#allocation5], 16  }
  0x39   : > { %714 = vsyncadd (%p797_p1), [#allocation5], 4294967280  ;;  %s199_s5 = sand.u32 1, %s725_s13  }
  0x3a   : > { %s521_s6 = sshll.u32 %s199_s5, 3  ;;  %s200_s7 = scalar_lea.sflag [#allocation3], %s199_s5 }
  0x3b   : > { %s203_s8 = scalar_lea.vmem [#allocation7], %s521_s6 }
  0x3c   : > { %716 = dma.done.wait (%p805_p4), %s200_s7, 128  }
  0x3d   : > { %718 = vsyncadd (%p805_p4), %s200_s7, 4294967168 }
  0x3e   : > { %208 = sfence }
  0x3f   : > { %p233_p5 = scmp.lt.s32.totalorder %s733_s15, 1  ;;  %s243_s21 = sld [smem:[#allocation2]]  ;;  %v884_v0 = vld [vmem:[%s203_s8] sm:$0xff]  ;;  %v277_v3 = vlaneseq  ;;  %v746_v6 = vmov 1966171168  }
  0x40   : > { %s524_s10 = sld [smem:[#allocation2 + $0x1]]  ;;  %v275_v7 = vunpack.c.l.s4 %v746_v6 }
  0x41   : > { %s956_s15 = smov (!%p233_p5, %s733_s15), 1  ;;  %s526_s19 = sld [smem:[#allocation2 + $0x2]]  ;;  %v278_v13 = vshrl.u32 %v277_v3, 7  ;;  %vm906_vm0 = vcmp.lt.s32.totalorder %v277_v3, 256 }
  0x42   : > { %s528_s11 = sld [smem:[#allocation2 + $0x3]]  ;;  %v276_v16 = vunpack.c.0.s8 %v275_v7  ;;  %s551_s30 = sshll.u32 %s956_s15, 3 }
  0x43   : > { %s886_s12 = sld [smem:[#allocation6]]  ;;  %s240_s7 = scalar_lea.vmem %s939_s3, %s551_s30 }
  0x44   : > { %s530_s18 = sld [smem:[#allocation2 + $0x80]]  ;;  %v279_v28 = vsub.s32 %v276_v16, %v278_v13 }
  0x45   : > { %v244_v1 = vstv %s243_s21  ;;  %s531_s20 = sld [smem:[#allocation2 + $0x81]] }
  0x46   : > { %v247_v2 = vstv %s524_s10  ;;  %v245_v4 = vmul.f32 %v244_v1, %v884_v0  ;;  %s533_s22 = sld [smem:[#allocation2 + $0x82]] }
  0x47   : > { %v248_v5 = vmul.f32 %v247_v2, %v884_v0  ;;  %v255_v8 = vstv %s526_s19  ;;  %s535_s23 = sld [smem:[#allocation2 + $0x83]] }
  0x48   : > { %v256_v10 = vmul.f32 %v255_v8, %v884_v0  ;;  %v263_v11 = vstv %s528_s11  ;;  %s891_s24 = sld [smem:[#allocation6 + $0x1]] }
  0x49   : > { %v525_v9 = vrot.slane %v248_v5, 9  ;;  %v264_v12 = vmul.f32 %v263_v11, %v884_v0  ;;  %s539_s25 = sld [smem:[#allocation2 + $0x100]]  ;;  %v271_v24 = vstv %s886_s12 }
  0x4a   : > { %v527_v15 = vrot.slane %v256_v10, 10  ;;  %v295_v17 = vstv %s530_s18  ;;  %s540_s27 = sld [smem:[#allocation2 + $0x101]] }
  0x4b   : > { %v253_v14 = vadd.f32 %v525_v9, %v245_v4  ;;  %v529_v18 = vrot.slane %v264_v12, 11  ;;  %v298_v19 = vstv %s531_s20  ;;  %s542_s28 = sld [smem:[#allocation2 + $0x102]]  ;;  %v296_v21 = vmul.f32 %v295_v17, %v884_v0 }
  0x4c   : > { %v299_v22 = vmul.f32 %v298_v19, %v884_v0  ;;  %v306_v23 = vstv %s533_s22  ;;  %s544_s29 = sld [smem:[#allocation2 + $0x103]] }
  0x4d   : > { %v261_v20 = vadd.f32 %v527_v15, %v253_v14  ;;  %v307_v25 = vmul.f32 %v306_v23, %v884_v0  ;;  %v314_v26 = vstv %s535_s23  ;;  %s546_s4 = sld [smem:[#allocation6 + $0x2]] }
  0x4e   : > { %v532_v29 = vrot.slane %v299_v22, 9  ;;  %v315_v30 = vmul.f32 %v314_v26, %v884_v0  ;;  %v322_v44 = vstv %s891_s24 }
  0x4f   : > { %v269_v27 = vadd.f32 %v529_v18, %v261_v20  ;;  %v534_v31 = vrot.slane %v307_v25, 10  ;;  %v343_v32 = vstv %s539_s25 }
  0x50   : > { %v304_v34 = vadd.f32 %v532_v29, %v296_v21  ;;  %v536_v35 = vrot.slane %v315_v30, 11  ;;  %v344_v36 = vmul.f32 %v343_v32, %v884_v0  ;;  %v346_v37 = vstv %s540_s27 }
  0x51   : > { %v272_v33 = vadd.f32 %v271_v24, %v269_v27  ;;  %v354_v38 = vstv %s542_s28  ;;  %v347_v41 = vmul.f32 %v346_v37, %v884_v0 }
  0x52   : > { %v312_v40 = vadd.f32 %v534_v31, %v304_v34  ;;  %v355_v42 = vmul.f32 %v354_v38, %v884_v0  ;;  %v362_v45 = vstv %s544_s29 }
  0x53   : > { %v280_v39 = vrot.slane %v272_v33, %v279_v28  ;;  %v541_v48 = vrot.slane %v347_v41, 9  ;;  %v363_v50 = vmul.f32 %v362_v45, %v884_v0  ;;  %v370_v56 = vstv %s546_s4 }
  0x54   : > { %v320_v47 = vadd.f32 %v536_v35, %v312_v40  ;;  %v543_v49 = vrot.slane %v355_v42, 10 }
  0x55   : > { %v287_v46 = vrot.slane %v280_v39, %v279_v28  ;;  %v352_v52 = vadd.f32 %v541_v48, %v344_v36  ;;  %v545_v53 = vrot.slane %v363_v50, 11 }
  0x56   : > { %v323_v51 = vadd.f32 %v322_v44, %v320_v47 }
  0x57   : > { %293 = vst.msk [vmem:[%s240_s7] ss:$4 sm:$0x3] %vm906_vm0, %v287_v46  ;;  %v360_v55 = vadd.f32 %v543_v49, %v352_v52 }
  0x58   : > { %v331_v54 = vrot.slane %v323_v51, %v279_v28 }
  0x59   : > { %v368_v58 = vadd.f32 %v545_v53, %v360_v55 }
  0x5a   : > { %v338_v57 = vrot.slane %v331_v54, %v279_v28 }
  0x5b   : > { %v371_v59 = vadd.f32 %v370_v56, %v368_v58 }
  0x5c   : > { %538 = vst.msk [vmem:[%s240_s7 + $0x1] ss:$4 sm:$0x3] %vm906_vm0, %v338_v57 }
  0x5d   : > { %v379_v60 = vrot.slane %v371_v59, %v279_v28 }
  0x5f   : > { %v386_v61 = vrot.slane %v379_v60, %v279_v28 }
  0x61   : > { %547 = vst.msk [vmem:[%s240_s7 + $0x2] ss:$4 sm:$0x3] %vm906_vm0, %v386_v61 }
  0x62 PF: > { %s18_s17 = sadd.s32 1, %s741_s17   ;;  %s948_s12 = smov %s725_s13 }
  0x63   : > { %p15_p1 = scmp.ge.s32.totalorder %s18_s17, 4   ;;  %s949_s13 = smov %s729_s14 }
  0x64   : > { %s950_s14 = smov %s851_s9  ;;  %s951_s15 = smov %s737_s16 }
  0x65   : > { %s952_s16 = smov %s954_s26  ;;  %17 = sbr.rel (!%p15_p1) target bundleno = 6 (0x6), region = 84 }
  0x6a   :  { %420 = vsyncpa [#allocation3], 1 }
  0x6b   :  { %422 = vsyncpa [#allocation3 + $0x1], 1 }
  0x6c   :  { %423 = vsyncpa [#allocation4], 1 }
  0x6d   :  { %425 = vsyncpa [#allocation4 + $0x1], 1 }
  0x6e   :  { %426 = vsyncpa [#allocation5], 1 }
  0x6f   :  { %428 = vsyncpa [#allocation5 + $0x1], 1 }

</bundles_post_ra>
